<compile_context>
chip_gen: v6e
topology: v6e:2x2x1
jax: 0.10.0
libtpu: 0.0.40
codegen_flags: <defaults>
</compile_context>

<pallas_src>
import functools

import jax
import jax.numpy as jnp
from jax import lax
from jax.experimental import pallas as pl
from jax.experimental.pallas import tpu as pltpu


# ---------------------------------------------------------------------------
# Kernel: row-wise Lp normalize of a (tm, D) tile (reduction along lanes).
# ---------------------------------------------------------------------------
def _normalize_kernel(x_ref, o_ref, *, power, eps):
    x = x_ref[...].astype(jnp.float32)
    if power == 2:
        # Fast path: sum of squares on the VPU, rsqrt on the (free) EUP slot.
        s = jnp.sum(x * x, axis=1, keepdims=True)
        if eps > 0.0:
            s = jnp.maximum(s, eps * eps)  # matches F.cosine_similarity clamp
        o_ref[...] = (x * lax.rsqrt(s)).astype(o_ref.dtype)
    else:
        # Generic Lp path (matches the PyTorch formula verbatim, including its
        # NaN behavior for negative inputs with odd powers).
        s = jnp.sum(x ** power, axis=1, keepdims=True)
        norm = s ** (1.0 / power)
        if eps > 0.0:
            norm = jnp.maximum(norm, eps)
        o_ref[...] = (x / norm).astype(o_ref.dtype)


# ---------------------------------------------------------------------------
# Tile selection
# ---------------------------------------------------------------------------
def _sublane_multiple(dtype):
    bits = jnp.dtype(dtype).itemsize * 8
    if bits >= 32:
        return 8
    if bits == 16:
        return 16
    return 32


def _round_up(x, m):
    return ((x + m - 1) // m) * m


def _pick_row_tile(n, d, dtype, vmem_budget_bytes):
    """Largest row tile whose double-buffered in+out tiles fit the budget."""
    itemsize = jnp.dtype(dtype).itemsize
    sub = _sublane_multiple(dtype)
    # Pallas double-buffers each side: 2 input + 2 output (tm, D) tiles.
    bytes_per_row = 4 * d * itemsize
    tm = max(sub, (vmem_budget_bytes // max(bytes_per_row, 1)) // sub * sub)
    # TODO(synk): for huge D where even a (sub, D) tile blows the budget, add a
    # second 'arbitrary' grid axis over D with a two-pass (accumulate sum(x^2),
    # then scale) scheme instead of shrinking tm below ~256.
    tm = min(tm, _round_up(n, sub))  # never bigger than the (padded) array
    if n > sub:
        # Keep >= 2 grid steps so the single 'parallel' axis can be sharded
        # across v7x's two TensorCores (measured-neutral on v5e/v6e).
        tm = min(tm, _round_up(pl.cdiv(n, 2), sub))
    return tm


# ---------------------------------------------------------------------------
# Wrappers
# ---------------------------------------------------------------------------
def lp_normalize(x, power=2, *, eps=0.0, vmem_budget_bytes=24 * 1024 * 1024):
    """Lp-normalize rows of a (N, D) array: x / (sum_j x_ij^p)^(1/p)."""
    n, d = x.shape
    tm = _pick_row_tile(n, d, x.dtype, vmem_budget_bytes)
    kernel = functools.partial(_normalize_kernel, power=power, eps=float(eps))
    return pl.pallas_call(
        kernel,
        out_shape=jax.ShapeDtypeStruct((n, d), x.dtype),
        grid_spec=pltpu.PrefetchScalarGridSpec(
            num_scalar_prefetch=0,
            grid=(pl.cdiv(n, tm),),
            in_specs=[pl.BlockSpec((tm, d), lambda i: (i, 0))],
            out_specs=pl.BlockSpec((tm, d), lambda i: (i, 0)),
        ),
        compiler_params=pltpu.CompilerParams(
            dimension_semantics=("parallel",),
            vmem_limit_bytes=32 * 1024 * 1024,
        ),
    )(x)


def cosine_similarity(a, b, *, eps=1e-8):
    """Row-wise cosine similarity along the last dim (F.cosine_similarity)."""
    a_n = lp_normalize(a, power=2, eps=eps)
    b_n = lp_normalize(b, power=2, eps=eps)
    return jnp.sum(a_n.astype(jnp.float32) * b_n.astype(jnp.float32), axis=-1)


def loss_fn_ss(t1, p1, t2, p2):
    """CLD_Byol.loss_fn_SS((t1, p1), (t2, p2))."""
    return (2.0
            - jnp.mean(cosine_similarity(p1, lax.stop_gradient(t2)))
            - jnp.mean(cosine_similarity(p2, lax.stop_gradient(t1))))


# ---------------------------------------------------------------------------
# Pure-JAX references
# ---------------------------------------------------------------------------
def lp_normalize_ref(x, power=2, eps=0.0):
    xf = x.astype(jnp.float32)
    s = jnp.sum(xf ** power, axis=1, keepdims=True)
    norm = s ** (1.0 / power)
    if eps > 0.0:
        norm = jnp.maximum(norm, eps)
    return (xf / norm).astype(x.dtype)


def cosine_similarity_ref(a, b, eps=1e-8):
    af, bf = a.astype(jnp.float32), b.astype(jnp.float32)
    na = jnp.maximum(jnp.linalg.norm(af, axis=-1), eps)
    nb = jnp.maximum(jnp.linalg.norm(bf, axis=-1), eps)
    return jnp.sum(af * bf, axis=-1) / (na * nb)


def loss_fn_ss_ref(t1, p1, t2, p2):
    return (2.0
            - jnp.mean(cosine_similarity_ref(p1, t2))
            - jnp.mean(cosine_similarity_ref(p2, t1)))


if __name__ == "__main__":
    key = jax.random.PRNGKey(0)
    k1, k2, k3, k4, k5 = jax.random.split(key, 5)

    # Small BYOL-style head shapes: batch=64 embeddings of width 128.
    N, D = 64, 128
    x = jax.random.normal(k1, (N, D), dtype=jnp.float32)

    # 1) Normalize kernel (f32) vs reference.
    out = jax.block_until_ready(lp_normalize(x, power=2))
    ref = lp_normalize_ref(x, power=2)
    assert out.shape == x.shape and out.dtype == x.dtype
    assert jnp.allclose(out, ref, atol=1e-5, rtol=1e-5), "f32 normalize mismatch"

    # 2) Normalize kernel on bf16 (exercises the 16-row sublane tile rule).
    xb = x.astype(jnp.bfloat16)
    outb = jax.block_until_ready(lp_normalize(xb, power=2))
    refb = lp_normalize_ref(xb, power=2)
    assert outb.dtype == jnp.bfloat16
    assert jnp.allclose(outb.astype(jnp.float32), refb.astype(jnp.float32),
                        atol=2e-2, rtol=2e-2), "bf16 normalize mismatch"

    # 3) CLD_Byol.loss_fn_SS with the Pallas normalize on the hot path.
    t1 = jax.random.normal(k2, (N, D), dtype=jnp.float32)
    p1 = jax.random.normal(k3, (N, D), dtype=jnp.float32)
    t2 = jax.random.normal(k4, (N, D), dtype=jnp.float32)
    p2 = jax.random.normal(k5, (N, D), dtype=jnp.float32)
    loss = jax.block_until_ready(loss_fn_ss(t1, p1, t2, p2))
    loss_ref = loss_fn_ss_ref(t1, p1, t2, p2)
    assert jnp.allclose(loss, loss_ref, atol=1e-5, rtol=1e-5), "loss_SS mismatch"

    print("KERNEL_OK")
</pallas_src>

<mosaic_0001>
module attributes {stable_mosaic.version = 11 : i64} {
  func.func @_normalize_kernel(%arg0: i32, %arg1: memref<32x128xf32, #tpu.memory_space<vmem>>, %arg2: memref<32x128xf32, #tpu.memory_space<vmem>>) attributes {dimension_semantics = [#tpu.dimension_semantics<parallel>], iteration_bounds = array<i64: 2>, scalar_prefetch = 0 : i64, scratch_operands = 0 : i64, tpu.core_type = #tpu.core_type<tc>, window_params = [{transform_indices = @transform_0, window_bounds = array<i64: 32, 128>}, {transform_indices = @transform_1, window_bounds = array<i64: 32, 128>}]} {
    %c0 = arith.constant 0 : index
    %c0_0 = arith.constant 0 : index
    %0 = vector.load %arg1[%c0, %c0_0] : memref<32x128xf32, #tpu.memory_space<vmem>>, vector<32x128xf32>
    %1 = arith.mulf %0, %0 : vector<32x128xf32>
    %cst = arith.constant dense<0.000000e+00> : vector<32xf32>
    %2 = vector.multi_reduction <add>, %1, %cst [1] : vector<32x128xf32> to vector<32xf32>
    %3 = vector.shape_cast %2 : vector<32xf32> to vector<32x1xf32>
    %4 = math.rsqrt %3 : vector<32x1xf32>
    %5 = vector.broadcast %4 : vector<32x1xf32> to vector<32x128xf32>
    %6 = arith.mulf %0, %5 : vector<32x128xf32>
    %c0_1 = arith.constant 0 : index
    %c0_2 = arith.constant 0 : index
    %7 = vector.load %arg2[%c0_1, %c0_2] : memref<32x128xf32, #tpu.memory_space<vmem>>, vector<32x128xf32>
    tpu.vector_store %arg2[%c0_1, %c0_2], %6 {strides = array<i32>} : memref<32x128xf32, #tpu.memory_space<vmem>>, vector<32x128xf32>,
    return
  }
  func.func @transform_0(%arg0: i32) -> (i32, i32) {
    %c0_i32 = arith.constant 0 : i32
    %c0_i32_0 = arith.constant 0 : i32
    return %arg0, %c0_i32 : i32, i32
  }
  func.func @transform_1(%arg0: i32) -> (i32, i32) {
    %c0_i32 = arith.constant 0 : i32
    %c0_i32_0 = arith.constant 0 : i32
    return %arg0, %c0_i32 : i32, i32
  }
}

</mosaic_0001>

<bundles_post_ra>
// kernel: tpu_custom_call.1
= control target key start
LH: loop header
LB: loop body
LE: loop exit
PB: predicated region body
PF: predicated region fallthrough
CT: control target
= control target key end

     0   :  { %6 = vsyncpa [#allocation3], 0  ;;  %s594_s0 = inlined_call_operand.hbm [shape: f32[64,128], index: 0, kind: input, shape index: {}]   ;;  %s595_s1 = inlined_call_operand.hbm [shape: f32[64,128], index: 1, kind: output, shape index: {}]  }
   0x1   :  { %8 = vsyncpa [#allocation3 + $0x1], 0 }
   0x2   :  { %9 = vsyncpa [#allocation4], 0 }
   0x3   :  { %11 = vsyncpa [#allocation4 + $0x1], 0  ;;  %s436_s6 = smov 0   ;;  %s438_s7 = smov 0  }
   0x4   :  { %s440_s8 = smov 0   ;;  %s442_s9 = smov 0  }
   0x5 LB: > { %s457_s10 = sadd.s32 4294967295, %s418_s9   ;;  %s252_s11 = sadd.s32 4294967294, %s418_s9   ;;  %s418_s9 = sphi %s442_s9, %s610_s9   ;;  %s414_s8 = sphi %s440_s8, %s609_s8   ;;  %s410_s7 = sphi %s438_s7, %s608_s7   ;;  %s406_s6 = sphi %s436_s6, %s607_s6  }
   0x6   : > { %s461_s12 = sadd.s32 1, %s418_s9   ;;  %s24_s13 = sadd.s32 1, %s414_s8 }
   0x7   : > { %s21_s14 = ssub.s32 %s418_s9, %s461_s12  ;;  %p31_p0 = scmp.ne.s32.totalorder %s414_s8, %s410_s7 }
   0x8   : > { %p22_p1 = scmp.eq.s32.totalorder %s21_s14, 0  ;;  %p32_p2 = scmp.eq.s32.totalorder %s418_s9, 0 }
   0x9   : > { %p37_p3 = scmp.ne.s32.totalorder %s410_s7, %s406_s6  ;;  %p38_p4 = scmp.eq.s32.totalorder %s457_s10, 0 }
   0xa   : > { %s473_s15 = scalar_select %p22_p1, %s414_s8, %s24_s13  }
   0xb   : > { %p475_p5 = por %p32_p2, %p31_p0  ;;  %p479_p6 = por %p38_p4, %p37_p3 }
   0xc   : > { %p61_p7 = scmp.eq.s32.totalorder %s457_s10, 1  ;;  %p67_p8 = scmp.eq.s32.totalorder %s252_s11, 1 }
   0xd   : > { %s599_s17 = scalar_select %p479_p6, 1, 0 }
   0xe   : > { %p280_p10 = scmp.lt.s32.totalorder %s418_s9, 2  ;;  %p486_p11 = por %p61_p7, %p31_p0 }
   0xf   : > { %p490_p12 = por %p67_p8, %p37_p3  ;;  %s87_s20 = sand.u32 1, %s414_s8  }
  0x10   : > { %s600_s18 = scalar_select %p486_p11, 1, 0 }
  0x11   : > { %s601_s19 = scalar_select %p490_p12, 1, 0 }
  0x12   : > { %s266_s21 = sshll.u32 %s418_s9, 9  ;;  %s255_s22 = sshll.u32 %s87_s20, 5 }
  0x13   : > { %s499_s25 = scalar_lea.hbm %s594_s0, %s266_s21  ;;  %s91_s26 = scalar_lea.vmem [#allocation2], %s255_s22 }
  0x14   : > { %s98_s27 = sshll.u32 %s91_s26, 4  ;;  %p503_p13 = pnand %p280_p10, %p475_p5  ;;  %s507_s27 = int_to_ptr.vmem [resolvable:$true] %s98_s27 }
  0x15   : > { %s509_s29 = scalar_lea.sflag [#allocation3], %s87_s20  ;;  %s326_s30 = scalar_lea.hbm %s499_s25, 512 }
  0x16   : > { %p327_p0 = scmp.ne.s32.totalorder %s499_s25, %s326_s30  ;;  %p328_p1 = pneg %p503_p13 }
  0x17   : > { %s331_s4 = scalar_lea.hbm %s594_s0, 1024  ;;  %p332_p4 = scmp.lt.s32.totalorder %s499_s25, %s594_s0 }
  0x18   : > { %p329_p2 = pnand %p328_p1, %p327_p0  ;;  %p333_p5 = scmp.lt.s32.totalorder %s331_s4, %s326_s30 }
  0x1a   : > { %p330_p3 = pneg %p329_p2  ;;  %p334_p7 = por %p333_p5, %p332_p4 }
  0x1c   : > { %p335_p8 = pnand %p334_p7, %p330_p3 }
  0x1e   : > { %338 = shalt.err (!%p335_p8)
}
  0x1f   : > { %s339_s13 = scalar_lea.vmem %s507_s27, 512  ;;  %s420_s14 = smov [#allocation2]  }
  0x20   : > { %p340_p10 = scmp.ne.s32.totalorder %s507_s27, %s339_s13  ;;  %s344_s16 = sshll.u32 %s420_s14, 4  ;;  %s345_s16 = int_to_ptr.vmem [resolvable:$false] %s344_s16 }
  0x21   : > { %s346_s20 = scalar_lea.vmem %s345_s16, 1024  ;;  %p347_p2 = scmp.lt.s32.totalorder %s507_s27, %s345_s16 }
  0x22   : > { %p342_p9 = pnand %p340_p10, %p328_p1  ;;  %p348_p12 = scmp.lt.s32.totalorder %s346_s20, %s339_s13 }
  0x24   : > { %p343_p0 = pneg %p342_p9  ;;  %p349_p11 = por %p348_p12, %p347_p2 }
  0x26   : > { %p350_p6 = pnand %p349_p11, %p343_p0 }
  0x28   : > { %353 = shalt.err (!%p350_p6)
}
  0x29   : > { %s421_s21 = smov 128   ;;  %s422_s22 = smov 8  }
  0x2a   : > { %275 = dma.hbm_to_vmem [thread:$0]  (!%p503_p13), %s499_s25, 512, %s507_s27, %s509_s29, %s421_s21, %s421_s21, %s422_s22  }
  0x2b   : > { %p258_p9 = scmp.ge.s32.totalorder %s418_s9, 1  ;;  %p106_p1 = scmp.lt.s32.totalorder %s418_s9, 3 }
  0x2d   : > { %p107_p3 = pnand %p258_p9, %p106_p1 }
  0x2e   : > { %s533_s23 = sand.u32 (!%p107_p3), 1, %s410_s7   ;;  %p603_p6 = scmp.ne.s32.totalorder (!%p107_p3), %s599_s17, 0 }
  0x2f   : > { %110 = sbr.rel (%p107_p3) target bundleno = 229 (0xe5), region = 24  ;;  %s259_s24 = sshll.u32 (!%p107_p3), %s533_s23, 5 }
  0x30   : > { %s113_s26 = scalar_lea.sflag (!%p107_p3), [#allocation3], %s533_s23  ;;  %s116_s30 = scalar_lea.vmem (!%p107_p3), [#allocation2], %s259_s24 }
  0x34   : > { %397 = dma.done.wait (%p603_p6), %s113_s26, 512  }
  0x35   : > { %399 = vsyncadd (%p603_p6), %s113_s26, 4294966784  ;;  %v139_v0 = vld [vmem:[%s116_s30 + $0x10] sm:$0xff]  ;;  %v137_v1 = vld [vmem:[%s116_s30] sm:$0xff]  ;;  %s267_s17 = sshll.u32 %s457_s10, 9  ;;  %s134_s25 = scalar_lea.vmem [#allocation5], %s259_s24 }
  0x36   : > { %v140_v2 = vld [vmem:[%s116_s30 + $0x18] sm:$0xff]  ;;  %v143_v3 = vmul.f32 %v139_v0, %v139_v0  ;;  %v141_v4 = vmul.f32 %v137_v1, %v137_v1  ;;  %v138_v5 = vld [vmem:[%s116_s30 + $0x8] sm:$0xff]  ;;  %s179_s27 = sshll.u32 %s134_s25, 4  ;;  %s549_s2 = scalar_lea.hbm %s595_s1, %s267_s17  ;;  %s551_s27 = int_to_ptr.vmem [resolvable:$true] %s179_s27 }
  0x37   : > { %v144_v6 = vmul.f32 %v140_v2, %v140_v2  ;;  %v142_v7 = vmul.f32 %v138_v5, %v138_v5  ;;  %s166_s10 = scalar_lea.sflag [#allocation4], %s533_s23  ;;  %s354_s3 = scalar_lea.vmem %s551_s27, 512 }
  0x38   : > { %149 = vadd.xlane.f32.xlu1 %v143_v3  ;;  %145 = vadd.xlane.f32.xlu0 %v141_v4  ;;  %p355_p11 = scmp.ne.s32.totalorder %s551_s27, %s354_s3  ;;  %p604_p12 = scmp.ne.s32.totalorder %s600_s18, 0 }
  0x39   : > { %s423_s4 = smov [#allocation5]  }
  0x3a   : > { %p356_p13 = pnand %p355_p11, %p604_p12  ;;  %s358_s5 = sshll.u32 %s423_s4, 4  ;;  %s359_s5 = int_to_ptr.vmem [resolvable:$false] %s358_s5 }
  0x3b   : > { %s360_s11 = scalar_lea.vmem %s359_s5, 1024  ;;  %p361_p5 = scmp.lt.s32.totalorder %s551_s27, %s359_s5 }
  0x3c   : > { %151 = vadd.xlane.f32.xlu1 %v144_v6  ;;  %147 = vadd.xlane.f32.xlu0 %v142_v7  ;;  %p357_p4 = pneg %p356_p13  ;;  %p362_p7 = scmp.lt.s32.totalorder %s360_s11, %s354_s3 }
  0x3e   : > { %p363_p8 = por %p362_p7, %p361_p5 }
  0x40   : > { %p364_p10 = pnand %p363_p8, %p357_p4 }
  0xc1   : > { %v150_v8 = vpop.xlane.xlu1 %149  ;;  %v146_v9 = vpop.xlane.xlu0 %145 }
  0xc2   : > { %318 = vrsqrt.f32 %v150_v8 }
  0xc3   : > { %320 = vrsqrt.f32 %v146_v9 }
  0xc5   : > { %v152_v10 = vpop.xlane.xlu1 %151  ;;  %v148_v11 = vpop.xlane.xlu0 %147 }
  0xc6   : > { %322 = vrsqrt.f32 %v152_v10 }
  0xc7   : > { %324 = vrsqrt.f32 %v148_v11 }
  0xcf   : > { %v319_v12 = vpop.eup %318 }
  0xd0   : > { %v321_v13 = vpop.eup %320  ;;  %v159_v14 = vmul.f32 %v319_v12, %v139_v0 }
  0xd1   : > { %v157_v15 = vmul.f32 %v321_v13, %v137_v1 }
  0xd2   : > { %163 = vst [vmem:[%s134_s25 + $0x10] sm:$0xff] %v159_v14 }
  0xd3   : > { %v323_v16 = vpop.eup %322  ;;  %161 = vst [vmem:[%s134_s25] sm:$0xff] %v157_v15 }
  0xd4   : > { %v325_v17 = vpop.eup %324  ;;  %v160_v18 = vmul.f32 %v323_v16, %v140_v2 }
  0xd5   : > { %v158_v19 = vmul.f32 %v325_v17, %v138_v5 }
  0xd6   : > { %164 = vst [vmem:[%s134_s25 + $0x18] sm:$0xff] %v160_v18 }
  0xd7   : > { %162 = vst [vmem:[%s134_s25 + $0x8] sm:$0xff] %v158_v19 }
  0xd8   : > { %367 = shalt.err (!%p364_p10)
}
  0xd9   : > { %s368_s13 = scalar_lea.hbm %s549_s2, 512  ;;  %s372_s20 = scalar_lea.hbm %s595_s1, 1024 }
  0xda   : > { %p369_p0 = scmp.ne.s32.totalorder %s549_s2, %s368_s13  ;;  %p373_p1 = scmp.lt.s32.totalorder %s549_s2, %s595_s1 }
  0xdb   : > { %p374_p3 = scmp.lt.s32.totalorder %s372_s20, %s368_s13 }
  0xdc   : > { %p370_p2 = pnand %p369_p0, %p604_p12 }
  0xdd   : > { %p375_p6 = por %p374_p3, %p373_p1 }
  0xde   : > { %p371_p9 = pneg %p370_p2 }
  0xe0   : > { %p376_p11 = pnand %p375_p6, %p371_p9 }
  0xe2   : > { %379 = shalt.err (!%p376_p11)
}
  0xe3   : > { %s424_s24 = smov 128   ;;  %s425_s26 = smov 8  }
  0xe4   : > { %270 = dma.vmem_to_hbm [thread:$0]  (%p604_p12), %s551_s27, 512, %s549_s2, %s166_s10, %s424_s24, %s424_s24, %s425_s26  }
  0xe5 PF: > { %s194_s30 = sand.u32 1, %s406_s6   ;;  %p605_p13 = scmp.ne.s32.totalorder %s601_s19, 0 }
  0xe6   : > { %p606_p4 = scmp.ge.s32.totalorder %s418_s9, 2  ;;  %s195_s17 = scalar_lea.sflag [#allocation4], %s194_s30 }
  0xe8   : > { %p277_p5 = pnand %p606_p4, %p605_p13 }
  0xea   : > { %p278_p7 = pneg %p277_p5 }
  0xec   : > { %401 = dma.done.wait (%p278_p7), %s195_s17, 512  }
  0xed   : > { %403 = vsyncadd (%p278_p7), %s195_s17, 4294966784  ;;  %p14_p8 = scmp.ge.s32.totalorder %s461_s12, 4   ;;  %s607_s6 = smov %s410_s7 }
  0xee   : > { %s608_s7 = smov %s414_s8  ;;  %s609_s8 = smov %s473_s15 }
  0xef   : > { %s610_s9 = smov %s461_s12  ;;  %16 = sbr.rel (!%p14_p8) target bundleno = 5 (0x5), region = 69 }
  0xf4   :  { %200 = vsyncpa [#allocation3], 1 }
  0xf5   :  { %202 = vsyncpa [#allocation3 + $0x1], 1 }
  0xf6   :  { %203 = vsyncpa [#allocation4], 1 }
  0xf7   :  { %205 = vsyncpa [#allocation4 + $0x1], 1 }

</bundles_post_ra>
